<compile_context>
chip_gen: v6e
topology: v6e:2x2x1
jax: 0.10.0
libtpu: 0.0.40
codegen_flags: <defaults>
</compile_context>

<pallas_src>
import jax
import jax.numpy as jnp
from jax.experimental import pallas as pl
from jax.experimental.pallas import tpu as pltpu

# Scaled-down hyperparameters (the production module uses
# input=188, hidden=512, frames=750, classes=56, global=1).
INPUT_SIZE = 64
HIDDEN_SIZE = 128
N_OF_FRAMES = 8
NUM_CLASSES = 56
GLOBAL_FEATURES_SIZE = 1
BATCH = 2

T_BLK = 4                                    # timesteps per grid step (8-32 at T=750)
LANE = 128
NC_PAD = ((NUM_CLASSES + LANE - 1) // LANE) * LANE   # lane-dense output width


def _make_kernel(t_blk, hidden):
    H = hidden

    def kernel(xw_ref, whh_ref, wlin_ref, init_ref, out_ref, h_sc, c_sc, acc_sc):
        """One grid step == t_blk LSTM timesteps. h/c/acc live in VMEM across steps."""
        tb = pl.program_id(0)

        @pl.when(tb == 0)
        def _():
            h_sc[...] = jnp.zeros_like(h_sc)
            c_sc[...] = jnp.zeros_like(c_sc)
            # Global-feature + bias contribution of the final Linear.
            acc_sc[...] = init_ref[...]

        def step(i, carry):
            h, c, acc = carry
            # x @ W_ih^T + b is precomputed (hoisted out of the recurrence);
            # only the recurrent matmul sits on the serial critical path.
            gates = xw_ref[i] + jnp.dot(
                h.astype(jnp.bfloat16), whh_ref[...],
                preferred_element_type=jnp.float32)            # (B, 4H) f32

            # PyTorch gate order: i, f, g, o
            i_g = jax.nn.sigmoid(gates[:, 0 * H:1 * H])
            f_g = jax.nn.sigmoid(gates[:, 1 * H:2 * H])
            g_g = jnp.tanh(gates[:, 2 * H:3 * H])
            o_g = jax.nn.sigmoid(gates[:, 3 * H:4 * H])

            c_new = f_g * c + i_g * g_g
            h_new = o_g * jnp.tanh(c_new)

            # Fused, lane-dense slice of the final Linear for this timestep.
            acc_new = acc + jnp.dot(
                h_new.astype(jnp.bfloat16), wlin_ref[i],
                preferred_element_type=jnp.float32)            # (B, NC_PAD) f32
            return (h_new, c_new, acc_new)

        h, c, acc = jax.lax.fori_loop(
            0, t_blk, step, (h_sc[...], c_sc[...], acc_sc[...]), unroll=True)
        h_sc[...] = h
        c_sc[...] = c
        acc_sc[...] = acc

        @pl.when(tb == pl.num_programs(0) - 1)
        def _():
            out_ref[...] = acc_sc[...]       # single lane-dense store at the end

    return kernel


def lstm_forward(local_f, global_f, params, t_blk=T_BLK):
    B, T, C = local_f.shape
    H = HIDDEN_SIZE
    NC = NUM_CLASSES
    assert T % t_blk == 0, "time axis must be divisible by the time-block size"
    n_blk = T // t_blk

    x_tbc = jnp.swapaxes(local_f, 0, 1)                        # (T, B, C)

    # Hoisted input projection: one big parallel matmul (bf16 operands, f32 acc).
    wih_t = params["w_ih"].T.astype(jnp.bfloat16)              # (C, 4H)
    bias = (params["b_ih"] + params["b_hh"]).reshape(1, 1, 4 * H)
    xw = jnp.einsum("tbc,cg->tbg",
                    x_tbc.astype(jnp.bfloat16), wih_t,
                    preferred_element_type=jnp.float32) + bias  # (T, B, 4H) f32

    whh_t = params["w_hh"].T.astype(jnp.bfloat16)              # (H, 4H), resident

    # Final Linear split into per-timestep slices, padded lane-dense NC -> NC_PAD.
    w_lin = params["w_lin"]                                    # (NC, T*H + G)
    w_h = w_lin[:, :T * H].T.reshape(T, H, NC)                 # (T, H, NC)
    w_h = jnp.pad(w_h, ((0, 0), (0, 0), (0, NC_PAD - NC))).astype(jnp.bfloat16)

    # Global-feature + bias contribution (tiny, no serial dependence), used to
    # initialise the in-kernel accumulator.  Real matmul -> correct for any G.
    w_g = w_lin[:, T * H:]                                     # (NC, G)
    init = global_f @ w_g.T + params["b_lin"].reshape(1, NC)   # (B, NC) f32
    init = jnp.pad(init, ((0, 0), (0, NC_PAD - NC))).astype(jnp.float32)

    out_pad = pl.pallas_call(
        _make_kernel(t_blk, H),
        out_shape=jax.ShapeDtypeStruct((B, NC_PAD), jnp.float32),
        grid=(n_blk,),
        in_specs=[
            pl.BlockSpec((t_blk, B, 4 * H), lambda tb: (tb, 0, 0)),   # xW+b block
            pl.BlockSpec((H, 4 * H), lambda tb: (0, 0)),              # W_hh^T (resident)
            pl.BlockSpec((t_blk, H, NC_PAD), lambda tb: (tb, 0, 0)),  # Linear slices
            pl.BlockSpec((B, NC_PAD), lambda tb: (0, 0)),             # accumulator init
        ],
        out_specs=pl.BlockSpec((B, NC_PAD), lambda tb: (0, 0)),       # resident output
        scratch_shapes=[
            pltpu.VMEM((B, H), jnp.float32),          # h state
            pltpu.VMEM((B, H), jnp.float32),          # c state
            pltpu.VMEM((B, NC_PAD), jnp.float32),     # lane-dense output accumulator
        ],
        compiler_params=pltpu.CompilerParams(
            dimension_semantics=("arbitrary",),       # sequential recurrence over time
        ),
    )(xw, whh_t, w_h, init)

    return out_pad[:, :NC]


def reference_forward(local_f, global_f, params):
    """Pure-JAX (f32) reference mirroring the PyTorch module."""
    B, T, C = local_f.shape
    H = HIDDEN_SIZE
    w_ih, w_hh = params["w_ih"], params["w_hh"]
    b = params["b_ih"] + params["b_hh"]

    def step(carry, x_t):
        h, c = carry
        gates = x_t @ w_ih.T + h @ w_hh.T + b
        i = jax.nn.sigmoid(gates[:, 0 * H:1 * H])
        f = jax.nn.sigmoid(gates[:, 1 * H:2 * H])
        g = jnp.tanh(gates[:, 2 * H:3 * H])
        o = jax.nn.sigmoid(gates[:, 3 * H:4 * H])
        c = f * c + i * g
        h = o * jnp.tanh(c)
        return (h, c), h

    h0 = jnp.zeros((B, H), jnp.float32)
    c0 = jnp.zeros((B, H), jnp.float32)
    _, hs = jax.lax.scan(step, (h0, c0), jnp.swapaxes(local_f, 0, 1))
    h_all = jnp.swapaxes(hs, 0, 1)                             # (B, T, H)
    flat = jnp.concatenate([h_all.reshape(B, T * H), global_f], axis=1)
    return flat @ params["w_lin"].T + params["b_lin"]


def init_params(key):
    H, C, T = HIDDEN_SIZE, INPUT_SIZE, N_OF_FRAMES
    NC, G = NUM_CLASSES, GLOBAL_FEATURES_SIZE
    ks = jax.random.split(key, 6)
    k_lstm = 1.0 / (H ** 0.5)
    k_lin = 1.0 / ((T * H + G) ** 0.5)
    return {
        "w_ih": jax.random.uniform(ks[0], (4 * H, C), jnp.float32, -k_lstm, k_lstm),
        "w_hh": jax.random.uniform(ks[1], (4 * H, H), jnp.float32, -k_lstm, k_lstm),
        "b_ih": jax.random.uniform(ks[2], (4 * H,), jnp.float32, -k_lstm, k_lstm),
        "b_hh": jax.random.uniform(ks[3], (4 * H,), jnp.float32, -k_lstm, k_lstm),
        "w_lin": jax.random.uniform(ks[4], (NC, T * H + G), jnp.float32, -k_lin, k_lin),
        "b_lin": jax.random.uniform(ks[5], (NC,), jnp.float32, -k_lin, k_lin),
    }


if __name__ == "__main__":
    key = jax.random.PRNGKey(0)
    k_param, k_local, k_global = jax.random.split(key, 3)
    params = init_params(k_param)

    local_f = jax.random.normal(
        k_local, (BATCH, N_OF_FRAMES, INPUT_SIZE), jnp.float32)
    global_f = jax.random.normal(
        k_global, (BATCH, GLOBAL_FEATURES_SIZE), jnp.float32)

    out = jax.block_until_ready(lstm_forward(local_f, global_f, params))
    ref = jax.block_until_ready(reference_forward(local_f, global_f, params))

    assert out.shape == (BATCH, NUM_CLASSES) and out.dtype == jnp.float32
    assert jnp.allclose(out, ref, atol=1e-2, rtol=1e-2), "mismatch vs reference"
    print("KERNEL_OK")
</pallas_src>

<mosaic_0001>
module attributes {stable_mosaic.version = 11 : i64} {
  func.func @kernel(%arg0: i32, %arg1: memref<4x2x512xf32, #tpu.memory_space<vmem>>, %arg2: memref<128x512xbf16, #tpu.memory_space<vmem>>, %arg3: memref<4x128x128xbf16, #tpu.memory_space<vmem>>, %arg4: memref<2x128xf32, #tpu.memory_space<vmem>>, %arg5: memref<2x128xf32, #tpu.memory_space<vmem>>, %arg6: memref<2x128xf32, #tpu.memory_space<vmem>>, %arg7: memref<2x128xf32, #tpu.memory_space<vmem>>, %arg8: memref<2x128xf32, #tpu.memory_space<vmem>>) attributes {dimension_semantics = [#tpu.dimension_semantics<arbitrary>], iteration_bounds = array<i64: 2>, scalar_prefetch = 0 : i64, scratch_operands = 3 : i64, tpu.core_type = #tpu.core_type<tc>, window_params = [{transform_indices = @transform_0, window_bounds = array<i64: 4, 2, 512>}, {pipeline_mode = #tpu.pipeline_mode<synchronous>, transform_indices = @transform_1, window_bounds = array<i64: 128, 512>}, {transform_indices = @transform_2, window_bounds = array<i64: 4, 128, 128>}, {pipeline_mode = #tpu.pipeline_mode<synchronous>, transform_indices = @transform_3, window_bounds = array<i64: 2, 128>}, {pipeline_mode = #tpu.pipeline_mode<synchronous>, transform_indices = @transform_4, window_bounds = array<i64: 2, 128>}]} {
    %c0_i32 = arith.constant 0 : i32
    %0 = arith.cmpi eq, %arg0, %c0_i32 : i32
    %1 = arith.extui %0 : i1 to i32
    %c0_i32_0 = arith.constant 0 : i32
    %2 = arith.cmpi ne, %1, %c0_i32_0 : i32
    scf.if %2 {
      %cst_58 = arith.constant 0.000000e+00 : f32
      %164 = vector.broadcast %cst_58 : f32 to vector<2x128xf32>
      %c0_59 = arith.constant 0 : index
      %c0_60 = arith.constant 0 : index
      %165 = vector.load %arg6[%c0_59, %c0_60] : memref<2x128xf32, #tpu.memory_space<vmem>>, vector<2x128xf32>
      tpu.vector_store %arg6[%c0_59, %c0_60], %164 {strides = array<i32>} : memref<2x128xf32, #tpu.memory_space<vmem>>, vector<2x128xf32>,
      %cst_61 = arith.constant 0.000000e+00 : f32
      %166 = vector.broadcast %cst_61 : f32 to vector<2x128xf32>
      %c0_62 = arith.constant 0 : index
      %c0_63 = arith.constant 0 : index
      %167 = vector.load %arg7[%c0_62, %c0_63] : memref<2x128xf32, #tpu.memory_space<vmem>>, vector<2x128xf32>
      tpu.vector_store %arg7[%c0_62, %c0_63], %166 {strides = array<i32>} : memref<2x128xf32, #tpu.memory_space<vmem>>, vector<2x128xf32>,
      %c0_64 = arith.constant 0 : index
      %c0_65 = arith.constant 0 : index
      %168 = vector.load %arg4[%c0_64, %c0_65] : memref<2x128xf32, #tpu.memory_space<vmem>>, vector<2x128xf32>
      %c0_66 = arith.constant 0 : index
      %c0_67 = arith.constant 0 : index
      %169 = vector.load %arg8[%c0_66, %c0_67] : memref<2x128xf32, #tpu.memory_space<vmem>>, vector<2x128xf32>
      tpu.vector_store %arg8[%c0_66, %c0_67], %168 {strides = array<i32>} : memref<2x128xf32, #tpu.memory_space<vmem>>, vector<2x128xf32>,
    } else {
    }
    %c0 = arith.constant 0 : index
    %c0_1 = arith.constant 0 : index
    %3 = vector.load %arg6[%c0, %c0_1] : memref<2x128xf32, #tpu.memory_space<vmem>>, vector<2x128xf32>
    %c0_2 = arith.constant 0 : index
    %c0_3 = arith.constant 0 : index
    %4 = vector.load %arg7[%c0_2, %c0_3] : memref<2x128xf32, #tpu.memory_space<vmem>>, vector<2x128xf32>
    %c0_4 = arith.constant 0 : index
    %c0_5 = arith.constant 0 : index
    %5 = vector.load %arg8[%c0_4, %c0_5] : memref<2x128xf32, #tpu.memory_space<vmem>>, vector<2x128xf32>
    %c0_i32_6 = arith.constant 0 : i32
    %6 = arith.index_cast %c0_i32_6 : i32 to index
    %c0_7 = arith.constant 0 : index
    %c0_8 = arith.constant 0 : index
    %7 = vector.load %arg1[%6, %c0_7, %c0_8] : memref<4x2x512xf32, #tpu.memory_space<vmem>>, vector<1x2x512xf32>
    %8 = vector.shape_cast %7 : vector<1x2x512xf32> to vector<2x512xf32>
    %9 = arith.truncf %3 : vector<2x128xf32> to vector<2x128xbf16>
    %c0_9 = arith.constant 0 : index
    %c0_10 = arith.constant 0 : index
    %10 = vector.load %arg2[%c0_9, %c0_10] : memref<128x512xbf16, #tpu.memory_space<vmem>>, vector<128x512xbf16>
    %cst = arith.constant dense<0.000000e+00> : vector<2x512xf32>
    %11 = tpu.matmul %9, %10, %cst {dimension_numbers = #tpu.dot_dimension_numbers<[1], [0], [0], [1], [0, 0, 1, 1], [], []>} : vector<2x128xbf16>, vector<128x512xbf16>, vector<2x512xf32> -> vector<2x512xf32>
    %12 = arith.addf %8, %11 : vector<2x512xf32>
    %13 = vector.extract_strided_slice %12 {offsets = [0, 0], sizes = [2, 128], strides = [1, 1]} : vector<2x512xf32> to vector<2x128xf32>
    %14 = arith.negf %13 : vector<2x128xf32>
    %15 = math.exp %14 : vector<2x128xf32>
    %cst_11 = arith.constant 1.000000e+00 : f32
    %16 = vector.broadcast %cst_11 : f32 to vector<2x128xf32>
    %17 = arith.addf %16, %15 : vector<2x128xf32>
    %18 = arith.divf %16, %17 : vector<2x128xf32>
    %19 = vector.extract_strided_slice %12 {offsets = [0, 128], sizes = [2, 128], strides = [1, 1]} : vector<2x512xf32> to vector<2x128xf32>
    %20 = arith.negf %19 : vector<2x128xf32>
    %21 = math.exp %20 : vector<2x128xf32>
    %cst_12 = arith.constant 1.000000e+00 : f32
    %22 = vector.broadcast %cst_12 : f32 to vector<2x128xf32>
    %23 = arith.addf %22, %21 : vector<2x128xf32>
    %24 = arith.divf %22, %23 : vector<2x128xf32>
    %25 = vector.extract_strided_slice %12 {offsets = [0, 256], sizes = [2, 128], strides = [1, 1]} : vector<2x512xf32> to vector<2x128xf32>
    %26 = math.tanh %25 : vector<2x128xf32>
    %27 = vector.extract_strided_slice %12 {offsets = [0, 384], sizes = [2, 128], strides = [1, 1]} : vector<2x512xf32> to vector<2x128xf32>
    %28 = arith.negf %27 : vector<2x128xf32>
    %29 = math.exp %28 : vector<2x128xf32>
    %cst_13 = arith.constant 1.000000e+00 : f32
    %30 = vector.broadcast %cst_13 : f32 to vector<2x128xf32>
    %31 = arith.addf %30, %29 : vector<2x128xf32>
    %32 = arith.divf %30, %31 : vector<2x128xf32>
    %33 = arith.mulf %24, %4 : vector<2x128xf32>
    %34 = arith.mulf %18, %26 : vector<2x128xf32>
    %35 = arith.addf %33, %34 : vector<2x128xf32>
    %36 = math.tanh %35 : vector<2x128xf32>
    %37 = arith.mulf %32, %36 : vector<2x128xf32>
    %38 = arith.truncf %37 : vector<2x128xf32> to vector<2x128xbf16>
    %39 = arith.index_cast %c0_i32_6 : i32 to index
    %c0_14 = arith.constant 0 : index
    %c0_15 = arith.constant 0 : index
    %40 = vector.load %arg3[%39, %c0_14, %c0_15] : memref<4x128x128xbf16, #tpu.memory_space<vmem>>, vector<1x128x128xbf16>
    %41 = vector.shape_cast %40 : vector<1x128x128xbf16> to vector<128x128xbf16>
    %cst_16 = arith.constant dense<0.000000e+00> : vector<2x128xf32>
    %42 = tpu.matmul %38, %41, %cst_16 {dimension_numbers = #tpu.dot_dimension_numbers<[1], [0], [0], [1], [0, 0, 1, 1], [], []>} : vector<2x128xbf16>, vector<128x128xbf16>, vector<2x128xf32> -> vector<2x128xf32>
    %43 = arith.addf %5, %42 : vector<2x128xf32>
    %c1_i32 = arith.constant 1 : i32
    %44 = arith.index_cast %c1_i32 : i32 to index
    %c0_17 = arith.constant 0 : index
    %c0_18 = arith.constant 0 : index
    %45 = vector.load %arg1[%44, %c0_17, %c0_18] : memref<4x2x512xf32, #tpu.memory_space<vmem>>, vector<1x2x512xf32>
    %46 = vector.shape_cast %45 : vector<1x2x512xf32> to vector<2x512xf32>
    %47 = arith.truncf %37 : vector<2x128xf32> to vector<2x128xbf16>
    %c0_19 = arith.constant 0 : index
    %c0_20 = arith.constant 0 : index
    %48 = vector.load %arg2[%c0_19, %c0_20] : memref<128x512xbf16, #tpu.memory_space<vmem>>, vector<128x512xbf16>
    %cst_21 = arith.constant dense<0.000000e+00> : vector<2x512xf32>
    %49 = tpu.matmul %47, %48, %cst_21 {dimension_numbers = #tpu.dot_dimension_numbers<[1], [0], [0], [1], [0, 0, 1, 1], [], []>} : vector<2x128xbf16>, vector<128x512xbf16>, vector<2x512xf32> -> vector<2x512xf32>
    %50 = arith.addf %46, %49 : vector<2x512xf32>
    %51 = vector.extract_strided_slice %50 {offsets = [0, 0], sizes = [2, 128], strides = [1, 1]} : vector<2x512xf32> to vector<2x128xf32>
    %52 = arith.negf %51 : vector<2x128xf32>
    %53 = math.exp %52 : vector<2x128xf32>
    %cst_22 = arith.constant 1.000000e+00 : f32
    %54 = vector.broadcast %cst_22 : f32 to vector<2x128xf32>
    %55 = arith.addf %54, %53 : vector<2x128xf32>
    %56 = arith.divf %54, %55 : vector<2x128xf32>
    %57 = vector.extract_strided_slice %50 {offsets = [0, 128], sizes = [2, 128], strides = [1, 1]} : vector<2x512xf32> to vector<2x128xf32>
    %58 = arith.negf %57 : vector<2x128xf32>
    %59 = math.exp %58 : vector<2x128xf32>
    %cst_23 = arith.constant 1.000000e+00 : f32
    %60 = vector.broadcast %cst_23 : f32 to vector<2x128xf32>
    %61 = arith.addf %60, %59 : vector<2x128xf32>
    %62 = arith.divf %60, %61 : vector<2x128xf32>
    %63 = vector.extract_strided_slice %50 {offsets = [0, 256], sizes = [2, 128], strides = [1, 1]} : vector<2x512xf32> to vector<2x128xf32>
    %64 = math.tanh %63 : vector<2x128xf32>
    %65 = vector.extract_strided_slice %50 {offsets = [0, 384], sizes = [2, 128], strides = [1, 1]} : vector<2x512xf32> to vector<2x128xf32>
    %66 = arith.negf %65 : vector<2x128xf32>
    %67 = math.exp %66 : vector<2x128xf32>
    %cst_24 = arith.constant 1.000000e+00 : f32
    %68 = vector.broadcast %cst_24 : f32 to vector<2x128xf32>
    %69 = arith.addf %68, %67 : vector<2x128xf32>
    %70 = arith.divf %68, %69 : vector<2x128xf32>
    %71 = arith.mulf %62, %35 : vector<2x128xf32>
    %72 = arith.mulf %56, %64 : vector<2x128xf32>
    %73 = arith.addf %71, %72 : vector<2x128xf32>
    %74 = math.tanh %73 : vector<2x128xf32>
    %75 = arith.mulf %70, %74 : vector<2x128xf32>
    %76 = arith.truncf %75 : vector<2x128xf32> to vector<2x128xbf16>
    %77 = arith.index_cast %c1_i32 : i32 to index
    %c0_25 = arith.constant 0 : index
    %c0_26 = arith.constant 0 : index
    %78 = vector.load %arg3[%77, %c0_25, %c0_26] : memref<4x128x128xbf16, #tpu.memory_space<vmem>>, vector<1x128x128xbf16>
    %79 = vector.shape_cast %78 : vector<1x128x128xbf16> to vector<128x128xbf16>
    %cst_27 = arith.constant dense<0.000000e+00> : vector<2x128xf32>
    %80 = tpu.matmul %76, %79, %cst_27 {dimension_numbers = #tpu.dot_dimension_numbers<[1], [0], [0], [1], [0, 0, 1, 1], [], []>} : vector<2x128xbf16>, vector<128x128xbf16>, vector<2x128xf32> -> vector<2x128xf32>
    %81 = arith.addf %43, %80 : vector<2x128xf32>
    %c2_i32 = arith.constant 2 : i32
    %82 = arith.index_cast %c2_i32 : i32 to index
    %c0_28 = arith.constant 0 : index
    %c0_29 = arith.constant 0 : index
    %83 = vector.load %arg1[%82, %c0_28, %c0_29] : memref<4x2x512xf32, #tpu.memory_space<vmem>>, vector<1x2x512xf32>
    %84 = vector.shape_cast %83 : vector<1x2x512xf32> to vector<2x512xf32>
    %85 = arith.truncf %75 : vector<2x128xf32> to vector<2x128xbf16>
    %c0_30 = arith.constant 0 : index
    %c0_31 = arith.constant 0 : index
    %86 = vector.load %arg2[%c0_30, %c0_31] : memref<128x512xbf16, #tpu.memory_space<vmem>>, vector<128x512xbf16>
    %cst_32 = arith.constant dense<0.000000e+00> : vector<2x512xf32>
    %87 = tpu.matmul %85, %86, %cst_32 {dimension_numbers = #tpu.dot_dimension_numbers<[1], [0], [0], [1], [0, 0, 1, 1], [], []>} : vector<2x128xbf16>, vector<128x512xbf16>, vector<2x512xf32> -> vector<2x512xf32>
    %88 = arith.addf %84, %87 : vector<2x512xf32>
    %89 = vector.extract_strided_slice %88 {offsets = [0, 0], sizes = [2, 128], strides = [1, 1]} : vector<2x512xf32> to vector<2x128xf32>
    %90 = arith.negf %89 : vector<2x128xf32>
    %91 = math.exp %90 : vector<2x128xf32>
    %cst_33 = arith.constant 1.000000e+00 : f32
    %92 = vector.broadcast %cst_33 : f32 to vector<2x128xf32>
    %93 = arith.addf %92, %91 : vector<2x128xf32>
    %94 = arith.divf %92, %93 : vector<2x128xf32>
    %95 = vector.extract_strided_slice %88 {offsets = [0, 128], sizes = [2, 128], strides = [1, 1]} : vector<2x512xf32> to vector<2x128xf32>
    %96 = arith.negf %95 : vector<2x128xf32>
    %97 = math.exp %96 : vector<2x128xf32>
    %cst_34 = arith.constant 1.000000e+00 : f32
    %98 = vector.broadcast %cst_34 : f32 to vector<2x128xf32>
    %99 = arith.addf %98, %97 : vector<2x128xf32>
    %100 = arith.divf %98, %99 : vector<2x128xf32>
    %101 = vector.extract_strided_slice %88 {offsets = [0, 256], sizes = [2, 128], strides = [1, 1]} : vector<2x512xf32> to vector<2x128xf32>
    %102 = math.tanh %101 : vector<2x128xf32>
    %103 = vector.extract_strided_slice %88 {offsets = [0, 384], sizes = [2, 128], strides = [1, 1]} : vector<2x512xf32> to vector<2x128xf32>
    %104 = arith.negf %103 : vector<2x128xf32>
    %105 = math.exp %104 : vector<2x128xf32>
    %cst_35 = arith.constant 1.000000e+00 : f32
    %106 = vector.broadcast %cst_35 : f32 to vector<2x128xf32>
    %107 = arith.addf %106, %105 : vector<2x128xf32>
    %108 = arith.divf %106, %107 : vector<2x128xf32>
    %109 = arith.mulf %100, %73 : vector<2x128xf32>
    %110 = arith.mulf %94, %102 : vector<2x128xf32>
    %111 = arith.addf %109, %110 : vector<2x128xf32>
    %112 = math.tanh %111 : vector<2x128xf32>
    %113 = arith.mulf %108, %112 : vector<2x128xf32>
    %114 = arith.truncf %113 : vector<2x128xf32> to vector<2x128xbf16>
    %115 = arith.index_cast %c2_i32 : i32 to index
    %c0_36 = arith.constant 0 : index
    %c0_37 = arith.constant 0 : index
    %116 = vector.load %arg3[%115, %c0_36, %c0_37] : memref<4x128x128xbf16, #tpu.memory_space<vmem>>, vector<1x128x128xbf16>
    %117 = vector.shape_cast %116 : vector<1x128x128xbf16> to vector<128x128xbf16>
    %cst_38 = arith.constant dense<0.000000e+00> : vector<2x128xf32>
    %118 = tpu.matmul %114, %117, %cst_38 {dimension_numbers = #tpu.dot_dimension_numbers<[1], [0], [0], [1], [0, 0, 1, 1], [], []>} : vector<2x128xbf16>, vector<128x128xbf16>, vector<2x128xf32> -> vector<2x128xf32>
    %119 = arith.addf %81, %118 : vector<2x128xf32>
    %c3_i32 = arith.constant 3 : i32
    %120 = arith.index_cast %c3_i32 : i32 to index
    %c0_39 = arith.constant 0 : index
    %c0_40 = arith.constant 0 : index
    %121 = vector.load %arg1[%120, %c0_39, %c0_40] : memref<4x2x512xf32, #tpu.memory_space<vmem>>, vector<1x2x512xf32>
    %122 = vector.shape_cast %121 : vector<1x2x512xf32> to vector<2x512xf32>
    %123 = arith.truncf %113 : vector<2x128xf32> to vector<2x128xbf16>
    %c0_41 = arith.constant 0 : index
    %c0_42 = arith.constant 0 : index
    %124 = vector.load %arg2[%c0_41, %c0_42] : memref<128x512xbf16, #tpu.memory_space<vmem>>, vector<128x512xbf16>
    %cst_43 = arith.constant dense<0.000000e+00> : vector<2x512xf32>
    %125 = tpu.matmul %123, %124, %cst_43 {dimension_numbers = #tpu.dot_dimension_numbers<[1], [0], [0], [1], [0, 0, 1, 1], [], []>} : vector<2x128xbf16>, vector<128x512xbf16>, vector<2x512xf32> -> vector<2x512xf32>
    %126 = arith.addf %122, %125 : vector<2x512xf32>
    %127 = vector.extract_strided_slice %126 {offsets = [0, 0], sizes = [2, 128], strides = [1, 1]} : vector<2x512xf32> to vector<2x128xf32>
    %128 = arith.negf %127 : vector<2x128xf32>
    %129 = math.exp %128 : vector<2x128xf32>
    %cst_44 = arith.constant 1.000000e+00 : f32
    %130 = vector.broadcast %cst_44 : f32 to vector<2x128xf32>
    %131 = arith.addf %130, %129 : vector<2x128xf32>
    %132 = arith.divf %130, %131 : vector<2x128xf32>
    %133 = vector.extract_strided_slice %126 {offsets = [0, 128], sizes = [2, 128], strides = [1, 1]} : vector<2x512xf32> to vector<2x128xf32>
    %134 = arith.negf %133 : vector<2x128xf32>
    %135 = math.exp %134 : vector<2x128xf32>
    %cst_45 = arith.constant 1.000000e+00 : f32
    %136 = vector.broadcast %cst_45 : f32 to vector<2x128xf32>
    %137 = arith.addf %136, %135 : vector<2x128xf32>
    %138 = arith.divf %136, %137 : vector<2x128xf32>
    %139 = vector.extract_strided_slice %126 {offsets = [0, 256], sizes = [2, 128], strides = [1, 1]} : vector<2x512xf32> to vector<2x128xf32>
    %140 = math.tanh %139 : vector<2x128xf32>
    %141 = vector.extract_strided_slice %126 {offsets = [0, 384], sizes = [2, 128], strides = [1, 1]} : vector<2x512xf32> to vector<2x128xf32>
    %142 = arith.negf %141 : vector<2x128xf32>
    %143 = math.exp %142 : vector<2x128xf32>
    %cst_46 = arith.constant 1.000000e+00 : f32
    %144 = vector.broadcast %cst_46 : f32 to vector<2x128xf32>
    %145 = arith.addf %144, %143 : vector<2x128xf32>
    %146 = arith.divf %144, %145 : vector<2x128xf32>
    %147 = arith.mulf %138, %111 : vector<2x128xf32>
    %148 = arith.mulf %132, %140 : vector<2x128xf32>
    %149 = arith.addf %147, %148 : vector<2x128xf32>
    %150 = math.tanh %149 : vector<2x128xf32>
    %151 = arith.mulf %146, %150 : vector<2x128xf32>
    %152 = arith.truncf %151 : vector<2x128xf32> to vector<2x128xbf16>
    %153 = arith.index_cast %c3_i32 : i32 to index
    %c0_47 = arith.constant 0 : index
    %c0_48 = arith.constant 0 : index
    %154 = vector.load %arg3[%153, %c0_47, %c0_48] : memref<4x128x128xbf16, #tpu.memory_space<vmem>>, vector<1x128x128xbf16>
    %155 = vector.shape_cast %154 : vector<1x128x128xbf16> to vector<128x128xbf16>
    %cst_49 = arith.constant dense<0.000000e+00> : vector<2x128xf32>
    %156 = tpu.matmul %152, %155, %cst_49 {dimension_numbers = #tpu.dot_dimension_numbers<[1], [0], [0], [1], [0, 0, 1, 1], [], []>} : vector<2x128xbf16>, vector<128x128xbf16>, vector<2x128xf32> -> vector<2x128xf32>
    %157 = arith.addf %119, %156 : vector<2x128xf32>
    %c4_i32 = arith.constant 4 : i32
    %c0_50 = arith.constant 0 : index
    %c0_51 = arith.constant 0 : index
    %158 = vector.load %arg6[%c0_50, %c0_51] : memref<2x128xf32, #tpu.memory_space<vmem>>, vector<2x128xf32>
    tpu.vector_store %arg6[%c0_50, %c0_51], %151 {strides = array<i32>} : memref<2x128xf32, #tpu.memory_space<vmem>>, vector<2x128xf32>,
    %c0_52 = arith.constant 0 : index
    %c0_53 = arith.constant 0 : index
    %159 = vector.load %arg7[%c0_52, %c0_53] : memref<2x128xf32, #tpu.memory_space<vmem>>, vector<2x128xf32>
    tpu.vector_store %arg7[%c0_52, %c0_53], %149 {strides = array<i32>} : memref<2x128xf32, #tpu.memory_space<vmem>>, vector<2x128xf32>,
    %c0_54 = arith.constant 0 : index
    %c0_55 = arith.constant 0 : index
    %160 = vector.load %arg8[%c0_54, %c0_55] : memref<2x128xf32, #tpu.memory_space<vmem>>, vector<2x128xf32>
    tpu.vector_store %arg8[%c0_54, %c0_55], %157 {strides = array<i32>} : memref<2x128xf32, #tpu.memory_space<vmem>>, vector<2x128xf32>,
    %c1_i32_56 = arith.constant 1 : i32
    %161 = arith.cmpi eq, %arg0, %c1_i32_56 : i32
    %162 = arith.extui %161 : i1 to i32
    %c0_i32_57 = arith.constant 0 : i32
    %163 = arith.cmpi ne, %162, %c0_i32_57 : i32
    scf.if %163 {
      %c0_58 = arith.constant 0 : index
      %c0_59 = arith.constant 0 : index
      %164 = vector.load %arg8[%c0_58, %c0_59] : memref<2x128xf32, #tpu.memory_space<vmem>>, vector<2x128xf32>
      %c0_60 = arith.constant 0 : index
      %c0_61 = arith.constant 0 : index
      %165 = vector.load %arg5[%c0_60, %c0_61] : memref<2x128xf32, #tpu.memory_space<vmem>>, vector<2x128xf32>
      tpu.vector_store %arg5[%c0_60, %c0_61], %164 {strides = array<i32>} : memref<2x128xf32, #tpu.memory_space<vmem>>, vector<2x128xf32>,
    } else {
    }
    return
  }
  func.func @transform_0(%arg0: i32) -> (i32, i32, i32) {
    %c0_i32 = arith.constant 0 : i32
    %c0_i32_0 = arith.constant 0 : i32
    %c0_i32_1 = arith.constant 0 : i32
    return %arg0, %c0_i32, %c0_i32_0 : i32, i32, i32
  }
  func.func @transform_1(%arg0: i32) -> (i32, i32) {
    %c0_i32 = arith.constant 0 : i32
    %c0_i32_0 = arith.constant 0 : i32
    %c0_i32_1 = arith.constant 0 : i32
    return %c0_i32, %c0_i32_0 : i32, i32
  }
  func.func @transform_2(%arg0: i32) -> (i32, i32, i32) {
    %c0_i32 = arith.constant 0 : i32
    %c0_i32_0 = arith.constant 0 : i32
    %c0_i32_1 = arith.constant 0 : i32
    return %arg0, %c0_i32, %c0_i32_0 : i32, i32, i32
  }
  func.func @transform_3(%arg0: i32) -> (i32, i32) {
    %c0_i32 = arith.constant 0 : i32
    %c0_i32_0 = arith.constant 0 : i32
    %c0_i32_1 = arith.constant 0 : i32
    return %c0_i32, %c0_i32_0 : i32, i32
  }
  func.func @transform_4(%arg0: i32) -> (i32, i32) {
    %c0_i32 = arith.constant 0 : i32
    %c0_i32_0 = arith.constant 0 : i32
    %c0_i32_1 = arith.constant 0 : i32
    return %c0_i32, %c0_i32_0 : i32, i32
  }
}

</mosaic_0001>

<bundles_post_ra>
// kernel: tpu_custom_call.1
= control target key start
LH: loop header
LB: loop body
LE: loop exit
PB: predicated region body
PF: predicated region fallthrough
CT: control target
= control target key end

     0   :  { %9 = vsyncpa [#allocation6], 0  ;;  %s2717_s0 = inlined_call_operand.hbm [shape: f32[8,2,512], index: 0, kind: input, shape index: {}]   ;;  %s2718_s1 = inlined_call_operand.hbm [shape: bf16[128,512], index: 1, kind: input, shape index: {}]   ;;  %s2719_s2 = inlined_call_operand.hbm [shape: bf16[8,128,128], index: 2, kind: input, shape index: {}]   ;;  %s2720_s3 = inlined_call_operand.vmem [shape: f32[2,128], index: 3, kind: input, shape index: {}]   ;;  %s2721_s4 = inlined_call_operand.hbm [shape: f32[2,128], index: 4, kind: output, shape index: {}]  }
   0x1   :  { %11 = vsyncpa [#allocation6 + $0x1], 0 }
   0x2   :  { %12 = vsyncpa [#allocation9], 0 }
   0x3   :  { %13 = vsyncpa [#allocation7], 0  ;;  %s2219_s15 = smov 0   ;;  %s2221_s16 = smov 0  }
   0x4   :  { %s2223_s17 = smov 0   ;;  %s2225_s18 = smov 0  }
   0x5 LB: > { %s2240_s19 = sadd.s32 1, %s2177_s18   ;;  %s26_s20 = sadd.s32 1, %s2173_s17  ;;  %s2177_s18 = sphi %s2225_s18, %s2735_s18   ;;  %s2173_s17 = sphi %s2223_s17, %s2734_s17   ;;  %s2169_s16 = sphi %s2221_s16, %s2733_s16   ;;  %s2165_s15 = sphi %s2219_s15, %s2732_s15  }
   0x6   : > { %s23_s21 = ssub.s32 %s2177_s18, %s2240_s19  ;;  %p33_p0 = scmp.ne.s32.totalorder %s2173_s17, %s2169_s16 }
   0x7   : > { %p24_p1 = scmp.eq.s32.totalorder %s23_s21, 0  ;;  %p34_p2 = scmp.eq.s32.totalorder %s2177_s18, 0 }
   0x8   : > { %p1832_p3 = scmp.lt.s32.totalorder %s2177_s18, 2  ;;  %s168_s23 = sand.u32 1, %s2177_s18  }
   0x9   : > { %s2250_s22 = scalar_select %p24_p1, %s2173_s17, %s26_s20  }
   0xa   : > { %p35_p4 = por %p34_p2, %p33_p0  ;;  %s170_s24 = sand.u32 1, %s2173_s17  }
   0xb   : > { %s1543_s25 = sshll.u32 %s170_s24, 5  ;;  %s1689_s26 = sshll.u32 %s2177_s18, 9 }
   0xc   : > { %s2260_s29 = scalar_lea.hbm %s2717_s0, %s1689_s26  ;;  %s172_s30 = scalar_lea.vmem [#allocation5], %s1543_s25 }
   0xd   : > { %s180_s5 = sshll.u32 %s172_s30, 4  ;;  %p2262_p5 = pnand %p1832_p3, %p35_p4  ;;  %s2266_s5 = int_to_ptr.vmem [resolvable:$true] %s180_s5 }
   0xe   : > { %s2268_s7 = scalar_lea.sflag [#allocation6], %s168_s23  ;;  %s2025_s8 = scalar_lea.hbm %s2260_s29, 512 }
   0xf   : > { %p2026_p6 = scmp.ne.s32.totalorder %s2260_s29, %s2025_s8  ;;  %p2027_p7 = pneg %p2262_p5 }
  0x10   : > { %s2030_s11 = scalar_lea.hbm %s2717_s0, 1024  ;;  %p2031_p10 = scmp.lt.s32.totalorder %s2260_s29, %s2717_s0 }
  0x11   : > { %p2028_p8 = pnand %p2027_p7, %p2026_p6  ;;  %p2032_p11 = scmp.lt.s32.totalorder %s2030_s11, %s2025_s8 }
  0x13   : > { %p2029_p9 = pneg %p2028_p8  ;;  %p2033_p12 = por %p2032_p11, %p2031_p10 }
  0x15   : > { %p2034_p13 = pnand %p2033_p12, %p2029_p9 }
  0x17   : > { %2037 = shalt.err (!%p2034_p13)
}
  0x18   : > { %s2038_s14 = scalar_lea.vmem %s2266_s5, 512  ;;  %s2179_s20 = smov [#allocation5]  }
  0x19   : > { %p2039_p0 = scmp.ne.s32.totalorder %s2266_s5, %s2038_s14  ;;  %s2043_s21 = sshll.u32 %s2179_s20, 4  ;;  %s2044_s21 = int_to_ptr.vmem [resolvable:$false] %s2043_s21 }
  0x1a   : > { %s2045_s23 = scalar_lea.vmem %s2044_s21, 1024  ;;  %p2046_p3 = scmp.lt.s32.totalorder %s2266_s5, %s2044_s21 }
  0x1b   : > { %p2041_p1 = pnand %p2039_p0, %p2027_p7  ;;  %p2047_p4 = scmp.lt.s32.totalorder %s2045_s23, %s2038_s14 }
  0x1d   : > { %p2042_p2 = pneg %p2041_p1  ;;  %p2048_p6 = por %p2047_p4, %p2046_p3 }
  0x1f   : > { %p2049_p8 = pnand %p2048_p6, %p2042_p2 }
  0x21   : > { %2052 = shalt.err (!%p2049_p8)
}
  0x22   : > { %s2180_s25 = smov 128   ;;  %s2181_s26 = smov 8  }
  0x23   : > { %1827 = dma.hbm_to_vmem [thread:$0]  (!%p2262_p5), %s2260_s29, 512, %s2266_s5, %s2268_s7, %s2180_s25, %s2180_s25, %s2181_s26  }
  0x24   : > { %s1547_s27 = sshll.u32 %s170_s24, 8  ;;  %s2298_s8 = sadd.s32 4294967295, %s2177_s18  }
  0x25   : > { %s194_s28 = scalar_lea.vmem [#allocation10], %s1547_s27  ;;  %p39_p9 = scmp.ne.s32.totalorder %s2169_s16, %s2165_s15 }
  0x26   : > { %s202_s30 = sshll.u32 %s194_s28, 4  ;;  %p2722_p10 = scmp.eq.s32.totalorder %s2298_s8, 0  ;;  %s2330_s30 = int_to_ptr.vmem [resolvable:$true] %s202_s30 }
  0x27   : > { %p1540_p11 = scmp.ge.s32.totalorder %s2177_s18, 1  ;;  %p139_p12 = scmp.lt.s32.totalorder %s2177_s18, 3 }
  0x28   : > { %p2307_p13 = por %p2722_p10, %p39_p9  ;;  %s2182_s29 = smov [#allocation8]  }
  0x29   : > { %p2312_p1 = pnand %p1540_p11, %p139_p12  ;;  %s151_s5 = sshll.u32 %s2182_s29, 4  ;;  %s152_s5 = int_to_ptr.vmem [resolvable:$true] %s151_s5 }
  0x2a   : > { %s2725_s9 = scalar_select %p2307_p13, 1, 0 }
  0x2b   : > { %p1820_p2 = pneg %p2312_p1  ;;  %s1691_s15 = sshll.u32 %s2177_s18, 12 }
  0x2c   : > { %s2328_s13 = scalar_lea.hbm %s2719_s2, %s1691_s15  ;;  %s2064_s14 = scalar_lea.vmem %s152_s5, 4096 }
  0x2d   : > { %p2321_p3 = pnand %p1820_p2, %p2722_p10  ;;  %p2065_p6 = scmp.ne.s32.totalorder %s152_s5, %s2064_s14 }
  0x2e   : > { %p2072_p11 = scmp.lt.s32.totalorder %s152_s5, %s152_s5  ;;  %p2073_p12 = scmp.lt.s32.totalorder %s2064_s14, %s2064_s14 }
  0x2f   : > { %p2055_p4 = pneg %p2321_p3 }
  0x30   : > { %p2074_p2 = por %p2073_p12, %p2072_p11 }
  0x31   : > { %p2067_p8 = pnand %p2065_p6, %p2055_p4 }
  0x33   : > { %p2068_p9 = pneg %p2067_p8 }
  0x35   : > { %p2075_p0 = pnand %p2074_p2, %p2068_p9 }
  0x37   : > { %2078 = shalt.err (!%p2075_p0)
}
  0x38   : > { %s2183_s18 = smov 256   ;;  %s2184_s20 = smov 16  }
  0x39   : > { %1823 = dma.hbm_to_vmem [thread:$0]  (!%p2321_p3), %s2718_s1, 4096, %s152_s5, [#allocation9], %s2183_s18, %s2183_s18, %s2184_s20  }
  0x3a   : > { %s2079_s25 = scalar_lea.hbm %s2328_s13, 4096  ;;  %s2084_s28 = scalar_lea.hbm %s2719_s2, 8192 }
  0x3b   : > { %p2080_p4 = scmp.ne.s32.totalorder %s2328_s13, %s2079_s25  ;;  %p2085_p0 = scmp.lt.s32.totalorder %s2328_s13, %s2719_s2 }
  0x3c   : > { %p2086_p9 = scmp.lt.s32.totalorder %s2084_s28, %s2079_s25 }
  0x3d   : > { %p2082_p6 = pnand %p2080_p4, %p2027_p7 }
  0x3e   : > { %p2087_p11 = por %p2086_p9, %p2085_p0 }
  0x3f   : > { %p2083_p8 = pneg %p2082_p6 }
  0x41   : > { %p2088_p12 = pnand %p2087_p11, %p2083_p8 }
  0x43   : > { %2091 = shalt.err (!%p2088_p12)
}
  0x44   : > { %s2092_s5 = scalar_lea.vmem %s2330_s30, 4096  ;;  %s2185_s10 = smov [#allocation10]  }
  0x45   : > { %p2093_p3 = scmp.ne.s32.totalorder %s2330_s30, %s2092_s5  ;;  %s2097_s11 = sshll.u32 %s2185_s10, 4  ;;  %s2098_s11 = int_to_ptr.vmem [resolvable:$false] %s2097_s11 }
  0x46   : > { %s2099_s12 = scalar_lea.vmem %s2098_s11, 8192  ;;  %p2100_p6 = scmp.lt.s32.totalorder %s2330_s30, %s2098_s11 }
  0x47   : > { %p2095_p2 = pnand %p2093_p3, %p2027_p7  ;;  %p2101_p10 = scmp.lt.s32.totalorder %s2099_s12, %s2092_s5 }
  0x49   : > { %p2096_p4 = pneg %p2095_p2  ;;  %p2102_p13 = por %p2101_p10, %p2100_p6 }
  0x4b   : > { %p2103_p0 = pnand %p2102_p13, %p2096_p4 }
  0x4d   : > { %2106 = shalt.err (!%p2103_p0)
}
  0x4e   : > { %s2186_s14 = smov 64   ;;  %s2187_s18 = smov 4  }
  0x4f   : > { %1830 = dma.hbm_to_vmem [thread:$0]  (!%p2262_p5), %s2328_s13, 4096, %s2330_s30, %s2268_s7, %s2186_s14, %s2186_s14, %s2187_s18  }
  0x50   : > { %214 = sbr.rel (%p2312_p1) target bundleno = 1487 (0x5cf), region = 36  ;;  %s216_s20 = sand.u32 (!%p2312_p1), 1, %s2298_s8  }
  0x51   : > { %s218_s21 = sand.u32 (!%p2312_p1), 1, %s2169_s16   ;;  %s217_s25 = scalar_lea.sflag (!%p2312_p1), [#allocation6], %s216_s20 }
  0x52   : > { %s1552_s23 = sshll.u32 (!%p2312_p1), %s218_s21, 5  ;;  %p2728_p7 = scmp.ne.s32.totalorder (!%p2312_p1), %s2725_s9, 0 }
  0x53   : > { %s2366_s26 = scalar_lea.vmem (!%p2312_p1), [#allocation5], %s1552_s23 }
  0x55   : > { %2148 = dma.done.wait (%p2728_p7), %s217_s25, 512  }
  0x56   : > { %2150 = vsyncadd (%p2728_p7), %s217_s25, 4294966784  ;;  %p2729_p10 = scmp.eq.s32.totalorder %s2298_s8, 0 }
  0x58   : > { %2152 = dma.done.wait (%p2729_p10), [#allocation9], 4096   ;;  %p2730_p5 = pmov %p2729_p10 }
  0x59   : > { %s1554_s6 = sshll.u32 %s218_s21, 8 }
  0x5a   : > { %2154 = vsyncadd (%p2730_p5), [#allocation9], 4294963200  ;;  %s2376_s7 = scalar_lea.vmem [#allocation10], %s1554_s6 }
  0x5b   : > { %2156 = dma.done.wait (%p2728_p7), %s217_s25, 4096  }
  0x5c   : > { %2158 = vsyncadd (%p2728_p7), %s217_s25, 4294963200  ;;  %p2731_p13 = scmp.ne.s32.totalorder %s2298_s8, 0 }
  0x5e   : > { %264 = sbr.rel (%p2731_p13) target bundleno = 102 (0x66), region = 52 }
  0x63   : > { %v267_v0 = vld [vmem:[%s2720_s3] sm:$0x3]  ;;  %v2188_v1 = vmov 0.0  }
  0x64   : > { %265 = vst [vmem:[#allocation2] sm:$0x3] %v2188_v1  ;;  %266 = vst [vmem:[#allocation3] sm:$0x3] %v2188_v1 }
  0x65   : > { %268 = vst [vmem:[#allocation4] sm:$0x3] %v267_v0 }
  0x66 PF: > { %v2387_v2 = vld [vmem:[#allocation8 + $0xe4] ss:$16 sps:$4 sm:$0xff]   ;;  %v2389_v3 = vld [vmem:[#allocation8 + $0xec] ss:$16 sps:$4 sm:$0xff]   ;;  %v2189_v4 = vmov 0   ;;  %v2190_v38 = vmov 0.0   ;;  %v557_v48 = vlaneseq }
  0x67   : > { %498 = vmatprep.mubr.bf16.mxu0 %v2189_v4  ;;  %539 = vmatprep.mubr.bf16.mxu1 %v2189_v4  ;;  %v2394_v5 = vld [vmem:[#allocation8 + $0xe0] ss:$16 sps:$4 sm:$0xff]   ;;  %v2396_v6 = vld [vmem:[#allocation8 + $0xe8] ss:$16 sps:$4 sm:$0xff]   ;;  %v2399_v7 = vld [vmem:[#allocation8 + $0xc4] ss:$16 sps:$4 sm:$0xff]  }
  0x68   : > { %466 = vmatprep.subr.bf16.mxu0 %v2387_v2  ;;  %507 = vmatprep.subr.bf16.mxu1 %v2389_v3  ;;  %v2403_v8 = vld [vmem:[#allocation8 + $0xcc] ss:$16 sps:$4 sm:$0xff]   ;;  %v2405_v9 = vld [vmem:[#allocation8 + $0xc0] ss:$16 sps:$4 sm:$0xff]   ;;  %v2408_v10 = vld [vmem:[#allocation8 + $0xc8] ss:$16 sps:$4 sm:$0xff]  }
  0x69   : > { %467 = vmatpush1.bf16.msra.mxu0 %v2394_v5  ;;  %508 = vmatpush1.bf16.msra.mxu1 %v2396_v6  ;;  %v2411_v11 = vld [vmem:[#allocation8 + $0xa4] ss:$16 sps:$4 sm:$0xff]   ;;  %v2413_v12 = vld [vmem:[#allocation8 + $0xac] ss:$16 sps:$4 sm:$0xff]   ;;  %v2415_v13 = vld [vmem:[#allocation8 + $0xa0] ss:$16 sps:$4 sm:$0xff]  }
  0x6a   : > { %468 = vmatprep.subr.bf16.mxu0 %v2399_v7  ;;  %509 = vmatprep.subr.bf16.mxu1 %v2403_v8  ;;  %v2417_v14 = vld [vmem:[#allocation8 + $0xa8] ss:$16 sps:$4 sm:$0xff]   ;;  %v2421_v15 = vld [vmem:[#allocation8 + $0x84] ss:$16 sps:$4 sm:$0xff]   ;;  %v2425_v16 = vld [vmem:[#allocation8 + $0x8c] ss:$16 sps:$4 sm:$0xff]  }
  0x6b   : > { %v2427_v17 = vld [vmem:[#allocation8 + $0x80] ss:$16 sps:$4 sm:$0xff]   ;;  %v2431_v18 = vld [vmem:[#allocation8 + $0x88] ss:$16 sps:$4 sm:$0xff]   ;;  %v2433_v19 = vld [vmem:[#allocation8 + $0x64] ss:$16 sps:$4 sm:$0xff]  }
  0x6c   : > { %v2437_v20 = vld [vmem:[#allocation8 + $0x6c] ss:$16 sps:$4 sm:$0xff]   ;;  %v2439_v21 = vld [vmem:[#allocation8 + $0x60] ss:$16 sps:$4 sm:$0xff]   ;;  %v2441_v22 = vld [vmem:[#allocation8 + $0x68] ss:$16 sps:$4 sm:$0xff]  }
  0x6d   : > { %469 = vmatpush1.bf16.msra.mxu0 %v2405_v9  ;;  %510 = vmatpush1.bf16.msra.mxu1 %v2408_v10  ;;  %v2445_v23 = vld [vmem:[#allocation8 + $0x44] ss:$16 sps:$4 sm:$0xff]   ;;  %v2449_v24 = vld [vmem:[#allocation8 + $0x4c] ss:$16 sps:$4 sm:$0xff]   ;;  %v2453_v25 = vld [vmem:[#allocation8 + $0x40] ss:$16 sps:$4 sm:$0xff]  }
  0x6e   : > { %470 = vmatprep.subr.bf16.mxu0 %v2411_v11  ;;  %511 = vmatprep.subr.bf16.mxu1 %v2413_v12  ;;  %v2455_v26 = vld [vmem:[#allocation8 + $0x48] ss:$16 sps:$4 sm:$0xff]   ;;  %v2459_v27 = vld [vmem:[#allocation8 + $0x24] ss:$16 sps:$4 sm:$0xff]   ;;  %v2461_v28 = vld [vmem:[#allocation8 + $0x2c] ss:$16 sps:$4 sm:$0xff]  }
  0x6f   : > { %v2463_v29 = vld [vmem:[#allocation8 + $0x20] ss:$16 sps:$4 sm:$0xff]   ;;  %v2465_v30 = vld [vmem:[#allocation8 + $0x28] ss:$16 sps:$4 sm:$0xff]   ;;  %v2467_v31 = vld [vmem:[#allocation8 + $0x4] ss:$16 sps:$4 sm:$0xff]  }
  0x70   : > { %v2469_v32 = vld [vmem:[#allocation8 + $0xc] ss:$16 sps:$4 sm:$0xff]   ;;  %v2475_v33 = vld [vmem:[#allocation8] ss:$16 sps:$4 sm:$0xff]   ;;  %v2477_v34 = vld [vmem:[#allocation8 + $0x8] ss:$16 sps:$4 sm:$0xff]  }
  0x71   : > { %471 = vmatpush1.bf16.msra.mxu0 %v2415_v13  ;;  %512 = vmatpush1.bf16.msra.mxu1 %v2417_v14  ;;  %v269_v35 = vld [vmem:[#allocation2] sm:$0x3]  ;;  %vm2191_vm0 = vmmov 0   ;;  %v1930_v39 = vld [vmem:[%s2376_s7 + $0x30] sm:$0xff]   ;;  %v1931_v40 = vld [vmem:[%s2376_s7 + $0x28] sm:$0xff]   ;;  %v558_v50 = vshrl.u32 %v557_v48, 7 }
  0x72   : > { %472 = vmatprep.subr.bf16.mxu0 %v2421_v15  ;;  %513 = vmatprep.subr.bf16.mxu1 %v2425_v16  ;;  %v273_v36 = vpack.c.bf16 %v269_v35, %v269_v35  ;;  %v1929_v37 = vld [vmem:[%s2376_s7 + $0x38] sm:$0xff]   ;;  %v1932_v41 = vld [vmem:[%s2376_s7 + $0x20] sm:$0xff]   ;;  %v1934_v43 = vld [vmem:[%s2376_s7 + $0x10] sm:$0xff]   ;;  %v2192_v46 = vmov 1983009808   ;;  %p1683_p1 = scmp.ne.s32.totalorder %s2298_s8, 1 }
  0x73   : > { %v1933_v42 = vld [vmem:[%s2376_s7 + $0x18] sm:$0xff]   ;;  %v1935_v44 = vld [vmem:[%s2376_s7 + $0x8] sm:$0xff]   ;;  %v1936_v45 = vld [vmem:[%s2376_s7] sm:$0xff]   ;;  %v555_v47 = vunpack.c.l.s4 %v2192_v46 }
  0x74   : > { %v272_v62 = vld [vmem:[%s2366_s26] sm:$0xff] }
  0x75   : > { %473 = vmatpush1.bf16.msra.mxu0 %v2427_v17  ;;  %514 = vmatpush1.bf16.msra.mxu1 %v2431_v18  ;;  %v556_v49 = vunpack.c.0.s8 %v555_v47 }
  0x76   : > { %474 = vmatprep.subr.bf16.mxu0 %v2433_v19  ;;  %515 = vmatprep.subr.bf16.mxu1 %v2437_v20 }
  0x77   : > { %v2522_v53 = vsub.s32 %v556_v49, %v558_v50  ;;  %v270_v49 = vld [vmem:[#allocation3] sm:$0x3] }
  0x79   : > { %475 = vmatpush1.bf16.msra.mxu0 %v2439_v21  ;;  %516 = vmatpush1.bf16.msra.mxu1 %v2441_v22 }
  0x7a   : > { %476 = vmatprep.subr.bf16.mxu0 %v2445_v23  ;;  %517 = vmatprep.subr.bf16.mxu1 %v2449_v24 }
  0x7d   : > { %477 = vmatpush1.bf16.msra.mxu0 %v2453_v25  ;;  %518 = vmatpush1.bf16.msra.mxu1 %v2455_v26 }
  0x7e   : > { %478 = vmatprep.subr.bf16.mxu0 %v2459_v27  ;;  %519 = vmatprep.subr.bf16.mxu1 %v2461_v28 }
  0x81   : > { %479 = vmatpush1.bf16.msra.mxu0 %v2463_v29  ;;  %520 = vmatpush1.bf16.msra.mxu1 %v2465_v30 }
  0x82   : > { %480 = vmatprep.subr.bf16.mxu0 %v2467_v31  ;;  %521 = vmatprep.subr.bf16.mxu1 %v2469_v32 }
  0x85   : > { %481 = vmatpush1.bf16.msra.mxu0 %v2475_v33  ;;  %522 = vmatpush1.bf16.msra.mxu1 %v2477_v34 }
  0x86   : > { %710 = vmatprep.subr.bf16.mxu1 %v2387_v2  ;;  %1728 = vmatprep.subr.bf16.mxu0 %v2190_v38 }
  0x88   : > { %499 = vmatmul.mubr.bf16.vlgmr.msra.gmra.mxu0 %v273_v36  ;;  %540 = vmatmul.mubr.bf16.vlgmr.msra.gmra.mxu1 %v273_v36 }
  0x89   : > { %711 = vmatpush1.bf16.msra.mxu1 %v2394_v5  ;;  %742 = vmatprep.mubr.bf16.mxu1 %v2189_v4 }
  0x8a   : > { %712 = vmatprep.subr.bf16.mxu1 %v2399_v7  ;;  %1744 = vmatprep.mubr.msk.bf16.mxu0 %vm2191_vm0, %v2190_v38 }
  0x8b   : > { %1729 = vmatpush3.bf16.msra.mxu0 %v1929_v37 }
  0x8c   : > { %1730 = vmatprep.subr.bf16.mxu0 %v2190_v38 }
  0x8d   : > { %713 = vmatpush1.bf16.msra.mxu1 %v2405_v9 }
  0x8e   : > { %714 = vmatprep.subr.bf16.mxu1 %v2411_v11 }
  0x8f   : > { %1731 = vmatpush3.bf16.msra.mxu0 %v1930_v39 }
  0x90   : > { %1732 = vmatprep.subr.bf16.mxu0 %v2190_v38 }
  0x91   : > { %715 = vmatpush1.bf16.msra.mxu1 %v2415_v13 }
  0x92   : > { %716 = vmatprep.subr.bf16.mxu1 %v2421_v15 }
  0x93   : > { %1733 = vmatpush3.bf16.msra.mxu0 %v1931_v40 }
  0x94   : > { %1734 = vmatprep.subr.bf16.mxu0 %v2190_v38 }
  0x95   : > { %717 = vmatpush1.bf16.msra.mxu1 %v2427_v17 }
  0x96   : > { %718 = vmatprep.subr.bf16.mxu1 %v2433_v19 }
  0x97   : > { %1735 = vmatpush3.bf16.msra.mxu0 %v1932_v41 }
  0x98   : > { %1736 = vmatprep.subr.bf16.mxu0 %v2190_v38 }
  0x99   : > { %719 = vmatpush1.bf16.msra.mxu1 %v2439_v21 }
  0x9a   : > { %720 = vmatprep.subr.bf16.mxu1 %v2445_v23 }
  0x9b   : > { %1737 = vmatpush3.bf16.msra.mxu0 %v1933_v42 }
  0x9c   : > { %1738 = vmatprep.subr.bf16.mxu0 %v2190_v38 }
  0x9d   : > { %721 = vmatpush1.bf16.msra.mxu1 %v2453_v25 }
  0x9e   : > { %722 = vmatprep.subr.bf16.mxu1 %v2459_v27 }
  0x9f   : > { %1739 = vmatpush3.bf16.msra.mxu0 %v1934_v43 }
  0xa0   : > { %1740 = vmatprep.subr.bf16.mxu0 %v2190_v38 }
  0xa1   : > { %723 = vmatpush1.bf16.msra.mxu1 %v2463_v29 }
  0xa2   : > { %724 = vmatprep.subr.bf16.mxu1 %v2467_v31 }
  0xa3   : > { %1741 = vmatpush3.bf16.msra.mxu0 %v1935_v44 }
  0xa4   : > { %1742 = vmatprep.subr.bf16.mxu0 %v2190_v38 }
  0xa5   : > { %725 = vmatpush1.bf16.msra.mxu1 %v2475_v33 }
  0xa6   : > { %1748 = vmatprep.subr.bf16.mxu1 %v2190_v38 }
  0xa7   : > { %1743 = vmatpush3.bf16.msra.mxu0 %v1936_v45 }
  0xa8   : > { %751 = vmatprep.subr.bf16.mxu0 %v2389_v3 }
 0x148   : > { %v500_v51 = vpop.f32.mrf.mxu0  ;;  %v541_v52 = vpop.f32.mrf.mxu1 }
 0x14a   : > { %v502_v54 = vpop.f32.mrf.mxu0  ;;  %v543_v55 = vpop.f32.mrf.mxu1 }
 0x14b   : > { %v552_v56 = vcombine.low %v500_v51, %v502_v54  ;;  %v553_v57 = vcombine.low %v541_v52, %v543_v55 }
 0x14c   : > { %v504_v58 = vpop.f32.mrf.mxu0  ;;  %v545_v59 = vpop.f32.mrf.mxu1 }
 0x14d   : > { %v560_v60 = vrot.slane %v552_v56, %v2522_v53  ;;  %v567_v61 = vrot.slane %v553_v57, %v2522_v53 }
 0x14e   : > { %v505_v63 = vpop.f32.mrf.mxu0  ;;  %v546_v0 = vpop.f32.mrf.mxu1 }
 0x14f   : > { %v568_v1 = vcombine.low %v560_v60, %v567_v61  ;;  %v1937_v61 = vld [vmem:[%s2376_s7 + $0x78] sm:$0xff]   ;;  %v1939_v63 = vld [vmem:[%s2376_s7 + $0x68] sm:$0xff]   ;;  %v1940_v0 = vld [vmem:[%s2376_s7 + $0x60] sm:$0xff]  }
 0x151   : > { %v570_v35 = vadd.f32 %v568_v1, %v272_v62  ;;  %v1938_v62 = vld [vmem:[%s2376_s7 + $0x70] sm:$0xff]   ;;  %v1941_v1 = vld [vmem:[%s2376_s7 + $0x58] sm:$0xff]  }
 0x153   : > { %v1588_v36 = vmul.f32 -1.442695, %v570_v35  ;;  %v578_v37 = vrot.slane %v570_v35, 2  ;;  %v589_v40 = vrot.slane %v570_v35, 6  ;;  %v586_v43 = vrot.slane %v570_v35, 4  ;;  %v1942_v35 = vld [vmem:[%s2376_s7 + $0x50] sm:$0xff]  }
 0x155   : > { %1961 = vpow2.f32 %v1588_v36  ;;  %v1589_v39 = vmul.f32 -1.442695, %v578_v37  ;;  %v1590_v41 = vmul.f32 -1.442695, %v589_v40  ;;  %v1943_v36 = vld [vmem:[%s2376_s7 + $0x48] sm:$0xff]   ;;  %v1944_v37 = vld [vmem:[%s2376_s7 + $0x40] sm:$0xff]  }
 0x157   : > { %1963 = vpow2.f32 %v1589_v39 }
 0x158   : > { %1965 = vpow2.f32 %v1590_v41 }
 0x162   : > { %v1962_v42 = vpop.eup %1961 }
 0x163   : > { %v574_v44 = vadd.f32 1.0, %v1962_v42 }
 0x164   : > { %v1964_v45 = vpop.eup %1963 }
 0x165   : > { %1967 = vrcp.f32 %v574_v44  ;;  %v583_v46 = vadd.f32 1.0, %v1964_v45  ;;  %v1966_v47 = vpop.eup %1965 }
 0x166   : > { %1969 = vtanh.f32 %v586_v43  ;;  %v594_v52 = vadd.f32 1.0, %v1966_v47 }
 0x167   : > { %1971 = vrcp.f32 %v583_v46 }
 0x168   : > { %1973 = vrcp.f32 %v594_v52 }
 0x172   : > { %v1968_v48 = vpop.eup %1967 }
 0x173   : > { %v1970_v50 = vpop.eup %1969 }
 0x174   : > { %v1972_v51 = vpop.eup %1971  ;;  %v598_v55 = vmul.f32 %v1970_v50, %v1968_v48 }
 0x175   : > { %v597_v54 = vmul.f32 %v1972_v51, %v270_v49  ;;  %v1974_v57 = vpop.eup %1973 }
 0x177   : > { %v2527_v56 = vadd.f32 %v598_v55, %v597_v54  ;;  %v1599_v55 = vld [vmem:[%s2366_s26 + $0x8] sm:$0xff] }
 0x179   : > { %1975 = vtanh.f32 %v2527_v56 }
 0x186   : > { %v1976_v58 = vpop.eup %1975 }
 0x187   : > { %v601_v59 = vmul.f32 %v1976_v58, %v1974_v57 }
 0x189   : > { %v602_v60 = vpack.c.bf16 %v601_v59, %v601_v59 }
 0x18b   : > { %1745 = vmatmul.mubr.bf16.vlgmr.msra.gmra.mxu0 %v602_v60  ;;  %743 = vmatmul.mubr.bf16.vlgmr.msra.gmra.mxu1 %v602_v60 }
 0x18c   : > { %752 = vmatpush1.bf16.msra.mxu0 %v2396_v6  ;;  %783 = vmatprep.mubr.bf16.mxu0 %v2189_v4 }
 0x18d   : > { %753 = vmatprep.subr.bf16.mxu0 %v2403_v8  ;;  %1764 = vmatprep.mubr.msk.bf16.mxu1 %vm2191_vm0, %v2190_v38 }
 0x18e   : > { %1749 = vmatpush3.bf16.msra.mxu1 %v1937_v61 }
 0x18f   : > { %1750 = vmatprep.subr.bf16.mxu1 %v2190_v38 }
 0x190   : > { %754 = vmatpush1.bf16.msra.mxu0 %v2408_v10 }
 0x191   : > { %755 = vmatprep.subr.bf16.mxu0 %v2413_v12 }
 0x192   : > { %1751 = vmatpush3.bf16.msra.mxu1 %v1938_v62 }
 0x193   : > { %1752 = vmatprep.subr.bf16.mxu1 %v2190_v38 }
 0x194   : > { %756 = vmatpush1.bf16.msra.mxu0 %v2417_v14 }
 0x195   : > { %757 = vmatprep.subr.bf16.mxu0 %v2425_v16 }
 0x196   : > { %1753 = vmatpush3.bf16.msra.mxu1 %v1939_v63 }
 0x197   : > { %1754 = vmatprep.subr.bf16.mxu1 %v2190_v38 }
 0x198   : > { %758 = vmatpush1.bf16.msra.mxu0 %v2431_v18 }
 0x199   : > { %759 = vmatprep.subr.bf16.mxu0 %v2437_v20 }
 0x19a   : > { %1755 = vmatpush3.bf16.msra.mxu1 %v1940_v0 }
 0x19b   : > { %1756 = vmatprep.subr.bf16.mxu1 %v2190_v38 }
 0x19c   : > { %760 = vmatpush1.bf16.msra.mxu0 %v2441_v22 }
 0x19d   : > { %761 = vmatprep.subr.bf16.mxu0 %v2449_v24 }
 0x19e   : > { %1757 = vmatpush3.bf16.msra.mxu1 %v1941_v1 }
 0x19f   : > { %1758 = vmatprep.subr.bf16.mxu1 %v2190_v38 }
 0x1a0   : > { %762 = vmatpush1.bf16.msra.mxu0 %v2455_v26 }
 0x1a1   : > { %763 = vmatprep.subr.bf16.mxu0 %v2461_v28 }
 0x1a2   : > { %1759 = vmatpush3.bf16.msra.mxu1 %v1942_v35 }
 0x1a3   : > { %1760 = vmatprep.subr.bf16.mxu1 %v2190_v38 }
 0x1a4   : > { %764 = vmatpush1.bf16.msra.mxu0 %v2465_v30 }
 0x1a5   : > { %765 = vmatprep.subr.bf16.mxu0 %v2469_v32 }
 0x1a6   : > { %1761 = vmatpush3.bf16.msra.mxu1 %v1943_v36 }
 0x1a7   : > { %1762 = vmatprep.subr.bf16.mxu1 %v2190_v38 }
 0x1a8   : > { %766 = vmatpush1.bf16.msra.mxu0 %v2477_v34 }
 0x1a9   : > { %955 = vmatprep.subr.bf16.mxu0 %v2387_v2 }
 0x1aa   : > { %1763 = vmatpush3.bf16.msra.mxu1 %v1944_v37 }
 0x1ab   : > { %784 = vmatmul.mubr.bf16.vlgmr.msra.gmra.mxu0 %v602_v60  ;;  %996 = vmatprep.subr.bf16.mxu1 %v2389_v3 }
 0x1ac   : > { %956 = vmatpush1.bf16.msra.mxu0 %v2394_v5  ;;  %987 = vmatprep.mubr.bf16.mxu0 %v2189_v4 }
 0x1ad   : > { %957 = vmatprep.subr.bf16.mxu0 %v2399_v7 }
 0x1b0   : > { %958 = vmatpush1.bf16.msra.mxu0 %v2405_v9 }
 0x1b1   : > { %959 = vmatprep.subr.bf16.mxu0 %v2411_v11 }
 0x1b4   : > { %960 = vmatpush1.bf16.msra.mxu0 %v2415_v13 }
 0x1b5   : > { %961 = vmatprep.subr.bf16.mxu0 %v2421_v15 }
 0x1b8   : > { %962 = vmatpush1.bf16.msra.mxu0 %v2427_v17 }
 0x1b9   : > { %963 = vmatprep.subr.bf16.mxu0 %v2433_v19 }
 0x1bc   : > { %964 = vmatpush1.bf16.msra.mxu0 %v2439_v21 }
 0x1bd   : > { %965 = vmatprep.subr.bf16.mxu0 %v2445_v23 }
 0x1c0   : > { %966 = vmatpush1.bf16.msra.mxu0 %v2453_v25 }
 0x1c1   : > { %967 = vmatprep.subr.bf16.mxu0 %v2459_v27 }
 0x1c4   : > { %968 = vmatpush1.bf16.msra.mxu0 %v2463_v29 }
 0x1c5   : > { %969 = vmatprep.subr.bf16.mxu0 %v2467_v31 }
 0x1c8   : > { %970 = vmatpush1.bf16.msra.mxu0 %v2475_v33 }
 0x1c9   : > { %1768 = vmatprep.subr.bf16.mxu0 %v2190_v38 }
 0x24b   : > { %v2582_v39 = vpop.f32.mrf.mxu0  ;;  %v744_v40 = vpop.f32.mrf.mxu1 }
 0x24d   : > { %v1746_v41 = vpop.f32.mrf.mxu0  ;;  %v746_v42 = vpop.f32.mrf.mxu1 }
 0x24e   : > { %v796_v48 = vcombine.low %v744_v40, %v746_v42 }
 0x24f   : > { %v704_v43 = vpop.f32.mrf.mxu0  ;;  %v748_v44 = vpop.f32.mrf.mxu1 }
 0x250   : > { %v804_v52 = vrot.slane %v796_v48, %v2522_v53 }
 0x251   : > { %v1747_v45 = vpop.f32.mrf.mxu0  ;;  %v749_v46 = vpop.f32.mrf.mxu1 }
 0x26b   : > { %v785_v47 = vpop.f32.mrf.mxu0 }
 0x26d   : > { %v787_v49 = vpop.f32.mrf.mxu0 }
 0x26e   : > { %v797_v50 = vcombine.low %v785_v47, %v787_v49 }
 0x26f   : > { %v789_v51 = vpop.f32.mrf.mxu0 }
 0x270   : > { %v811_v54 = vrot.slane %v797_v50, %v2522_v53 }
 0x271   : > { %v790_v57 = vpop.f32.mrf.mxu0 }
 0x272   : > { %v812_v58 = vcombine.low %v804_v52, %v811_v54 }
 0x274   : > { %v814_v59 = vadd.f32 %v1599_v55, %v812_v58 }
 0x276   : > { %v1600_v60 = vmul.f32 -1.442695, %v814_v59  ;;  %v822_v61 = vrot.slane %v814_v59, 2  ;;  %v833_v63 = vrot.slane %v814_v59, 6  ;;  %v830_v35 = vrot.slane %v814_v59, 4 }
 0x278   : > { %1977 = vpow2.f32 %v1600_v60  ;;  %v1601_v62 = vmul.f32 -1.442695, %v822_v61  ;;  %v1602_v0 = vmul.f32 -1.442695, %v833_v63 }
 0x27a   : > { %1979 = vpow2.f32 %v1601_v62  ;;  %v1627_v62 = vld [vmem:[%s2366_s26 + $0x10] sm:$0xff] }
 0x27b   : > { %1981 = vpow2.f32 %v1602_v0 }
 0x285   : > { %v1978_v1 = vpop.eup %1977 }
 0x286   : > { %v818_v36 = vadd.f32 1.0, %v1978_v1 }
 0x287   : > { %v1980_v37 = vpop.eup %1979 }
 0x288   : > { %1983 = vrcp.f32 %v818_v36  ;;  %v827_v40 = vadd.f32 1.0, %v1980_v37  ;;  %v1982_v41 = vpop.eup %1981 }
 0x289   : > { %1985 = vtanh.f32 %v830_v35  ;;  %v838_v45 = vadd.f32 1.0, %v1982_v41 }
 0x28a   : > { %1987 = vrcp.f32 %v827_v40 }
 0x28b   : > { %1989 = vrcp.f32 %v838_v45 }
 0x295   : > { %v1984_v42 = vpop.eup %1983 }
 0x296   : > { %v1986_v43 = vpop.eup %1985 }
 0x297   : > { %v1988_v44 = vpop.eup %1987  ;;  %v842_v47 = vmul.f32 %v1986_v43, %v1984_v42 }
 0x298   : > { %v841_v46 = vmul.f32 %v1988_v44, %v2527_v56  ;;  %v1990_v49 = vpop.eup %1989 }
 0x29a   : > { %v2588_v48 = vadd.f32 %v842_v47, %v841_v46 }
 0x29c   : > { %1991 = vtanh.f32 %v2588_v48 }
 0x2a9   : > { %v1992_v50 = vpop.eup %1991 }
 0x2aa   : > { %v845_v51 = vmul.f32 %v1992_v50, %v1990_v49 }
 0x2ac   : > { %v846_v52 = vpack.c.bf16 %v845_v51, %v845_v51 }
 0x2ae   : > { %1765 = vmatmul.mubr.bf16.vlgmr.msra.gmra.mxu1 %v846_v52  ;;  %988 = vmatmul.mubr.bf16.vlgmr.msra.gmra.mxu0 %v846_v52 }
 0x2af   : > { %997 = vmatpush1.bf16.msra.mxu1 %v2396_v6  ;;  %1028 = vmatprep.mubr.bf16.mxu1 %v2189_v4 }
 0x2b0   : > { %998 = vmatprep.subr.bf16.mxu1 %v2403_v8  ;;  %1784 = vmatprep.mubr.msk.bf16.mxu0 %vm2191_vm0, %v2190_v38 }
 0x2b3   : > { %999 = vmatpush1.bf16.msra.mxu1 %v2408_v10 }
 0x2b4   : > { %1000 = vmatprep.subr.bf16.mxu1 %v2413_v12 }
 0x2b7   : > { %1001 = vmatpush1.bf16.msra.mxu1 %v2417_v14 }
 0x2b8   : > { %1002 = vmatprep.subr.bf16.mxu1 %v2425_v16 }
 0x2bb   : > { %1003 = vmatpush1.bf16.msra.mxu1 %v2431_v18 }
 0x2bc   : > { %1004 = vmatprep.subr.bf16.mxu1 %v2437_v20 }
 0x2bf   : > { %1005 = vmatpush1.bf16.msra.mxu1 %v2441_v22 }
 0x2c0   : > { %1006 = vmatprep.subr.bf16.mxu1 %v2449_v24 }
 0x2c3   : > { %1007 = vmatpush1.bf16.msra.mxu1 %v2455_v26 }
 0x2c4   : > { %1008 = vmatprep.subr.bf16.mxu1 %v2461_v28 }
 0x2c7   : > { %1009 = vmatpush1.bf16.msra.mxu1 %v2465_v30 }
 0x2c8   : > { %1010 = vmatprep.subr.bf16.mxu1 %v2469_v32 }
 0x2cb   : > { %1011 = vmatpush1.bf16.msra.mxu1 %v2477_v34 }
 0x2cc   : > { %1200 = vmatprep.subr.bf16.mxu1 %v2387_v2  ;;  %v1945_v2 = vld [vmem:[%s2376_s7 + $0xb8] sm:$0xff]  }
 0x2cd   : > { %1769 = vmatpush3.bf16.msra.mxu0 %v1945_v2 }
 0x2ce   : > { %1029 = vmatmul.mubr.bf16.vlgmr.msra.gmra.mxu1 %v846_v52  ;;  %1770 = vmatprep.subr.bf16.mxu0 %v2190_v38 }
 0x2cf   : > { %1201 = vmatpush1.bf16.msra.mxu1 %v2394_v5  ;;  %1232 = vmatprep.mubr.bf16.mxu1 %v2189_v4  ;;  %v1946_v5 = vld [vmem:[%s2376_s7 + $0xb0] sm:$0xff]  }
 0x2d0   : > { %1202 = vmatprep.subr.bf16.mxu1 %v2399_v7  ;;  %v1947_v7 = vld [vmem:[%s2376_s7 + $0xa8] sm:$0xff]  }
 0x2d1   : > { %1771 = vmatpush3.bf16.msra.mxu0 %v1946_v5 }
 0x2d2   : > { %1772 = vmatprep.subr.bf16.mxu0 %v2190_v38 }
 0x2d3   : > { %1203 = vmatpush1.bf16.msra.mxu1 %v2405_v9  ;;  %v1948_v9 = vld [vmem:[%s2376_s7 + $0xa0] sm:$0xff]  }
 0x2d4   : > { %1204 = vmatprep.subr.bf16.mxu1 %v2411_v11  ;;  %v1949_v11 = vld [vmem:[%s2376_s7 + $0x98] sm:$0xff]  }
 0x2d5   : > { %1773 = vmatpush3.bf16.msra.mxu0 %v1947_v7 }
 0x2d6   : > { %1774 = vmatprep.subr.bf16.mxu0 %v2190_v38 }
 0x2d7   : > { %1205 = vmatpush1.bf16.msra.mxu1 %v2415_v13  ;;  %v1950_v13 = vld [vmem:[%s2376_s7 + $0x90] sm:$0xff]  }
 0x2d8   : > { %1206 = vmatprep.subr.bf16.mxu1 %v2421_v15  ;;  %v1951_v15 = vld [vmem:[%s2376_s7 + $0x88] sm:$0xff]  }
 0x2d9   : > { %1775 = vmatpush3.bf16.msra.mxu0 %v1948_v9 }
 0x2da   : > { %1776 = vmatprep.subr.bf16.mxu0 %v2190_v38 }
 0x2db   : > { %1207 = vmatpush1.bf16.msra.mxu1 %v2427_v17  ;;  %v1952_v17 = vld [vmem:[%s2376_s7 + $0x80] sm:$0xff]  }
 0x2dc   : > { %1208 = vmatprep.subr.bf16.mxu1 %v2433_v19  ;;  %v271_v19 = vld [vmem:[#allocation4] sm:$0x3] }
 0x2dd   : > { %1777 = vmatpush3.bf16.msra.mxu0 %v1949_v11 }
 0x2de   : > { %1778 = vmatprep.subr.bf16.mxu0 %v2190_v38 }
 0x2df   : > { %1209 = vmatpush1.bf16.msra.mxu1 %v2439_v21  ;;  %v707_v21 = vadd.f32 %v2582_v39, %v271_v19 }
 0x2e0   : > { %1210 = vmatprep.subr.bf16.mxu1 %v2445_v23 }
 0x2e1   : > { %1779 = vmatpush3.bf16.msra.mxu0 %v1950_v13 }
 0x2e2   : > { %1780 = vmatprep.subr.bf16.mxu0 %v2190_v38 }
 0x2e3   : > { %1211 = vmatpush1.bf16.msra.mxu1 %v2453_v25 }
 0x2e4   : > { %1212 = vmatprep.subr.bf16.mxu1 %v2459_v27 }
 0x2e5   : > { %1781 = vmatpush3.bf16.msra.mxu0 %v1951_v15 }
 0x2e6   : > { %1782 = vmatprep.subr.bf16.mxu0 %v2190_v38 }
 0x2e7   : > { %1213 = vmatpush1.bf16.msra.mxu1 %v2463_v29 }
 0x2e8   : > { %1214 = vmatprep.subr.bf16.mxu1 %v2467_v31 }
 0x2e9   : > { %1783 = vmatpush3.bf16.msra.mxu0 %v1952_v17 }
 0x2ea   : > { %1241 = vmatprep.subr.bf16.mxu0 %v2389_v3 }
 0x2eb   : > { %1215 = vmatpush1.bf16.msra.mxu1 %v2475_v33 }
 0x2ec   : > { %1788 = vmatprep.subr.bf16.mxu1 %v2190_v38 }
 0x36e   : > { %v946_v23 = vpop.f32.mrf.mxu1  ;;  %v989_v25 = vpop.f32.mrf.mxu0 }
 0x36f   : > { %v2644_v27 = vadd.f32 %v946_v23, %v707_v21 }
 0x370   : > { %v1766_v29 = vpop.f32.mrf.mxu1  ;;  %v991_v31 = vpop.f32.mrf.mxu0 }
 0x371   : > { %v1041_v58 = vcombine.low %v989_v25, %v991_v31  ;;  %v1655_v31 = vld [vmem:[%s2366_s26 + $0x18] sm:$0xff] }
 0x372   : > { %v949_v33 = vpop.f32.mrf.mxu1  ;;  %v993_v56 = vpop.f32.mrf.mxu0 }
 0x373   : > { %v1049_v3 = vrot.slane %v1041_v58, %v2522_v53 }
 0x374   : > { %v1767_v54 = vpop.f32.mrf.mxu1  ;;  %v994_v55 = vpop.f32.mrf.mxu0 }
 0x38e   : > { %v1030_v57 = vpop.f32.mrf.mxu1 }
 0x390   : > { %v1032_v59 = vpop.f32.mrf.mxu1 }
 0x391   : > { %v1042_v60 = vcombine.low %v1030_v57, %v1032_v59 }
 0x392   : > { %v1034_v61 = vpop.f32.mrf.mxu1 }
 0x393   : > { %v1056_v39 = vrot.slane %v1042_v60, %v2522_v53 }
 0x394   : > { %v1035_v63 = vpop.f32.mrf.mxu1 }
 0x395   : > { %v1057_v0 = vcombine.low %v1049_v3, %v1056_v39 }
 0x397   : > { %v1059_v1 = vadd.f32 %v1627_v62, %v1057_v0 }
 0x399   : > { %v1628_v35 = vmul.f32 -1.442695, %v1059_v1  ;;  %v1067_v36 = vrot.slane %v1059_v1, 2  ;;  %v1078_v40 = vrot.slane %v1059_v1, 6  ;;  %v1075_v43 = vrot.slane %v1059_v1, 4 }
 0x39b   : > { %1993 = vpow2.f32 %v1628_v35  ;;  %v1629_v37 = vmul.f32 -1.442695, %v1067_v36  ;;  %v1630_v41 = vmul.f32 -1.442695, %v1078_v40 }
 0x39d   : > { %1995 = vpow2.f32 %v1629_v37 }
 0x39e   : > { %1997 = vpow2.f32 %v1630_v41 }
 0x3a8   : > { %v1994_v42 = vpop.eup %1993 }
 0x3a9   : > { %v1063_v44 = vadd.f32 1.0, %v1994_v42 }
 0x3aa   : > { %v1996_v45 = vpop.eup %1995 }
 0x3ab   : > { %1999 = vrcp.f32 %v1063_v44  ;;  %v1072_v46 = vadd.f32 1.0, %v1996_v45  ;;  %v1998_v47 = vpop.eup %1997 }
 0x3ac   : > { %2001 = vtanh.f32 %v1075_v43  ;;  %v1083_v52 = vadd.f32 1.0, %v1998_v47 }
 0x3ad   : > { %2003 = vrcp.f32 %v1072_v46 }
 0x3ae   : > { %2005 = vrcp.f32 %v1083_v52 }
 0x3b8   : > { %v2000_v49 = vpop.eup %1999 }
 0x3b9   : > { %v2002_v50 = vpop.eup %2001 }
 0x3ba   : > { %v2004_v51 = vpop.eup %2003  ;;  %v1087_v5 = vmul.f32 %v2002_v50, %v2000_v49 }
 0x3bb   : > { %v1086_v2 = vmul.f32 %v2004_v51, %v2588_v48  ;;  %v2006_v9 = vpop.eup %2005 }
 0x3bd   : > { %v2650_v7 = vadd.f32 %v1087_v5, %v1086_v2 }
 0x3bf   : > { %2007 = vtanh.f32 %v2650_v7 }
 0x3cc   : > { %v2008_v11 = vpop.eup %2007 }
 0x3cd   : > { %v1090_v13 = vmul.f32 %v2008_v11, %v2006_v9 }
 0x3cf   : > { %v1091_v15 = vpack.c.bf16 %v1090_v13, %v1090_v13 }
 0x3d1   : > { %1785 = vmatmul.mubr.bf16.vlgmr.msra.gmra.mxu0 %v1091_v15  ;;  %1233 = vmatmul.mubr.bf16.vlgmr.msra.gmra.mxu1 %v1091_v15 }
 0x3d2   : > { %1242 = vmatpush1.bf16.msra.mxu0 %v2396_v6  ;;  %1273 = vmatprep.mubr.bf16.mxu0 %v2189_v4  ;;  %v1953_v4 = vld [vmem:[%s2376_s7 + $0xf8] sm:$0xff]   ;;  %v1954_v6 = vld [vmem:[%s2376_s7 + $0xf0] sm:$0xff]  }
 0x3d3   : > { %1243 = vmatprep.subr.bf16.mxu0 %v2403_v8  ;;  %1804 = vmatprep.mubr.msk.bf16.mxu1 %vm2191_vm0, %v2190_v38  ;;  %v1955_v8 = vld [vmem:[%s2376_s7 + $0xe8] sm:$0xff]  }
 0x3d4   : > { %1789 = vmatpush3.bf16.msra.mxu1 %v1953_v4 }
 0x3d5   : > { %1790 = vmatprep.subr.bf16.mxu1 %v2190_v38 }
 0x3d6   : > { %1244 = vmatpush1.bf16.msra.mxu0 %v2408_v10  ;;  %v1956_v10 = vld [vmem:[%s2376_s7 + $0xe0] sm:$0xff]  }
 0x3d7   : > { %1245 = vmatprep.subr.bf16.mxu0 %v2413_v12  ;;  %v1957_v12 = vld [vmem:[%s2376_s7 + $0xd8] sm:$0xff]  }
 0x3d8   : > { %1791 = vmatpush3.bf16.msra.mxu1 %v1954_v6 }
 0x3d9   : > { %1792 = vmatprep.subr.bf16.mxu1 %v2190_v38 }
 0x3da   : > { %1246 = vmatpush1.bf16.msra.mxu0 %v2417_v14  ;;  %v1958_v14 = vld [vmem:[%s2376_s7 + $0xd0] sm:$0xff]  }
 0x3db   : > { %1247 = vmatprep.subr.bf16.mxu0 %v2425_v16  ;;  %v1959_v16 = vld [vmem:[%s2376_s7 + $0xc8] sm:$0xff]  }
 0x3dc   : > { %1793 = vmatpush3.bf16.msra.mxu1 %v1955_v8 }
 0x3dd   : > { %1794 = vmatprep.subr.bf16.mxu1 %v2190_v38 }
 0x3de   : > { %1248 = vmatpush1.bf16.msra.mxu0 %v2431_v18  ;;  %v1960_v18 = vld [vmem:[%s2376_s7 + $0xc0] sm:$0xff]  }
 0x3df   : > { %1249 = vmatprep.subr.bf16.mxu0 %v2437_v20 }
 0x3e0   : > { %1795 = vmatpush3.bf16.msra.mxu1 %v1956_v10 }
 0x3e1   : > { %1796 = vmatprep.subr.bf16.mxu1 %v2190_v38 }
 0x3e2   : > { %1250 = vmatpush1.bf16.msra.mxu0 %v2441_v22 }
 0x3e3   : > { %1251 = vmatprep.subr.bf16.mxu0 %v2449_v24 }
 0x3e4   : > { %1797 = vmatpush3.bf16.msra.mxu1 %v1957_v12 }
 0x3e5   : > { %1798 = vmatprep.subr.bf16.mxu1 %v2190_v38 }
 0x3e6   : > { %1252 = vmatpush1.bf16.msra.mxu0 %v2455_v26 }
 0x3e7   : > { %1253 = vmatprep.subr.bf16.mxu0 %v2461_v28 }
 0x3e8   : > { %1799 = vmatpush3.bf16.msra.mxu1 %v1958_v14 }
 0x3e9   : > { %1800 = vmatprep.subr.bf16.mxu1 %v2190_v38 }
 0x3ea   : > { %1254 = vmatpush1.bf16.msra.mxu0 %v2465_v30 }
 0x3eb   : > { %1255 = vmatprep.subr.bf16.mxu0 %v2469_v32 }
 0x3ec   : > { %1801 = vmatpush3.bf16.msra.mxu1 %v1959_v16 }
 0x3ed   : > { %1802 = vmatprep.subr.bf16.mxu1 %v2190_v38 }
 0x3ee   : > { %1256 = vmatpush1.bf16.msra.mxu0 %v2477_v34 }
 0x3f0   : > { %1803 = vmatpush3.bf16.msra.mxu1 %v1960_v18 }
 0x3f1   : > { %1274 = vmatmul.mubr.bf16.vlgmr.msra.gmra.mxu0 %v1091_v15 }
 0x491   : > { %v1191_v20 = vpop.f32.mrf.mxu0  ;;  %v1234_v22 = vpop.f32.mrf.mxu1 }
 0x492   : > { %v1197_v24 = vadd.f32 %v1191_v20, %v2644_v27 }
 0x493   : > { %v1786_v26 = vpop.f32.mrf.mxu0  ;;  %v1236_v28 = vpop.f32.mrf.mxu1 }
 0x494   : > { %v1286_v19 = vcombine.low %v1234_v22, %v1236_v28 }
 0x495   : > { %v1194_v30 = vpop.f32.mrf.mxu0  ;;  %v1238_v32 = vpop.f32.mrf.mxu1 }
 0x496   : > { %v1294_v29 = vrot.slane %v1286_v19, %v2522_v53 }
 0x497   : > { %v1787_v34 = vpop.f32.mrf.mxu0  ;;  %v1239_v48 = vpop.f32.mrf.mxu1 }
 0x4b1   : > { %v1275_v17 = vpop.f32.mrf.mxu0 }
 0x4b3   : > { %v1277_v21 = vpop.f32.mrf.mxu0 }
 0x4b4   : > { %v1287_v23 = vcombine.low %v1275_v17, %v1277_v21 }
 0x4b5   : > { %v1279_v25 = vpop.f32.mrf.mxu0 }
 0x4b6   : > { %v1301_v38 = vrot.slane %v1287_v23, %v2522_v53 }
 0x4b7   : > { %v1280_v33 = vpop.f32.mrf.mxu0 }
 0x4b8   : > { %v1302_v56 = vcombine.low %v1294_v29, %v1301_v38 }
 0x4ba   : > { %v1304_v54 = vadd.f32 %v1655_v31, %v1302_v56 }
 0x4bc   : > { %v1656_v27 = vmul.f32 -1.442695, %v1304_v54  ;;  %v1312_v55 = vrot.slane %v1304_v54, 2  ;;  %v1323_v58 = vrot.slane %v1304_v54, 6  ;;  %v1320_v61 = vrot.slane %v1304_v54, 4 }
 0x4be   : > { %2009 = vpow2.f32 %v1656_v27  ;;  %v1657_v57 = vmul.f32 -1.442695, %v1312_v55  ;;  %v1658_v59 = vmul.f32 -1.442695, %v1323_v58 }
 0x4c0   : > { %2011 = vpow2.f32 %v1657_v57 }
 0x4c1   : > { %2013 = vpow2.f32 %v1658_v59 }
 0x4cb   : > { %v2010_v60 = vpop.eup %2009 }
 0x4cc   : > { %v1308_v3 = vadd.f32 1.0, %v2010_v60 }
 0x4cd   : > { %v2012_v39 = vpop.eup %2011 }
 0x4ce   : > { %2015 = vrcp.f32 %v1308_v3  ;;  %v1317_v62 = vadd.f32 1.0, %v2012_v39  ;;  %v2014_v53 = vpop.eup %2013 }
 0x4cf   : > { %2017 = vtanh.f32 %v1320_v61  ;;  %v1328_v35 = vadd.f32 1.0, %v2014_v53 }
 0x4d0   : > { %2019 = vrcp.f32 %v1317_v62 }
 0x4d1   : > { %2021 = vrcp.f32 %v1328_v35 }
 0x4db   : > { %v2016_v63 = vpop.eup %2015 }
 0x4dc   : > { %v2018_v0 = vpop.eup %2017 }
 0x4dd   : > { %v2020_v1 = vpop.eup %2019  ;;  %v1332_v37 = vmul.f32 %v2018_v0, %v2016_v63 }
 0x4de   : > { %v1331_v36 = vmul.f32 %v2020_v1, %v2650_v7  ;;  %v2022_v41 = vpop.eup %2021 }
 0x4e0   : > { %v1333_v40 = vadd.f32 %v1332_v37, %v1331_v36 }
 0x4e2   : > { %2023 = vtanh.f32 %v1333_v40  ;;  %1444 = vst [vmem:[#allocation3] sm:$0x3] %v1333_v40 }
 0x4ef   : > { %v2024_v42 = vpop.eup %2023 }
 0x4f0   : > { %v1335_v43 = vmul.f32 %v2024_v42, %v2022_v41 }
 0x4f2   : > { %v1336_v44 = vpack.c.bf16 %v1335_v43, %v1335_v43  ;;  %1443 = vst [vmem:[#allocation2] sm:$0x3] %v1335_v43 }
 0x4f4   : > { %1805 = vmatmul.mubr.bf16.vlgmr.msra.gmra.mxu1 %v1336_v44 }
 0x5b4   : > { %v1436_v45 = vpop.f32.mrf.mxu1 }
 0x5b5   : > { %v1442_v46 = vadd.f32 %v1436_v45, %v1197_v24 }
 0x5b6   : > { %v1806_v47 = vpop.f32.mrf.mxu1  ;;  %1449 = sbr.rel (%p1683_p1) target bundleno = 1472 (0x5c0), region = 56 }
 0x5b7   : > { %1445 = vst [vmem:[#allocation4] sm:$0x3] %v1442_v46 }
 0x5b8   : > { %v1439_v49 = vpop.f32.mrf.mxu1 }
 0x5ba   : > { %v1807_v50 = vpop.f32.mrf.mxu1 }
 0x5be   : > { %v1450_v51 = vld [vmem:[#allocation4] sm:$0x3] }
 0x5bf   : > { %1451 = vst [vmem:[#allocation11] sm:$0x3] %v1450_v51 }
 0x5c0 PF: > { %p1834_p8 = scmp.eq.s32.totalorder %s2298_s8, 1  ;;  %s2193_s9 = smov [#allocation11]  }
 0x5c1   : > { %s1459_s13 = sshll.u32 %s2193_s9, 4  ;;  %s1460_s13 = int_to_ptr.vmem [resolvable:$true] %s1459_s13 }
 0x5c2   : > { %s2107_s27 = scalar_lea.vmem %s1460_s13, 32  ;;  %p2114_p3 = scmp.lt.s32.totalorder %s1460_s13, %s1460_s13 }
 0x5c3   : > { %p2108_p9 = scmp.ne.s32.totalorder %s1460_s13, %s2107_s27  ;;  %p2115_p2 = scmp.lt.s32.totalorder %s2107_s27, %s2107_s27 }
 0x5c5   : > { %p2109_p11 = pnand %p2108_p9, %p1834_p8  ;;  %p2116_p4 = por %p2115_p2, %p2114_p3 }
 0x5c7   : > { %p2110_p12 = pneg %p2109_p11 }
 0x5c9   : > { %p2117_p6 = pnand %p2116_p4, %p2110_p12 }
 0x5cb   : > { %2120 = shalt.err (!%p2117_p6)
}
 0x5cc   : > { %1817 = dma.vmem_to_hbm [thread:$0]  (%p1834_p8), %s1460_s13, 32, %s2721_s4, [#allocation7]  }
 0x5cd   : > { %2160 = dma.done.wait (%p1834_p8), [#allocation7], 32  }
 0x5ce   : > { %2162 = vsyncadd (%p1834_p8), [#allocation7], 4294967264 }
 0x5cf PF: > { %p16_p0 = scmp.ge.s32.totalorder %s2240_s19, 4   ;;  %s2732_s15 = smov %s2169_s16 }
 0x5d0   : > { %s2733_s16 = smov %s2173_s17  ;;  %s2734_s17 = smov %s2250_s22 }
 0x5d1   : > { %s2735_s18 = smov %s2240_s19  ;;  %18 = sbr.rel (!%p16_p0) target bundleno = 5 (0x5), region = 102 }
 0x5d6   :  { %1472 = vsyncpa [#allocation6], 1 }
 0x5d7   :  { %1474 = vsyncpa [#allocation6 + $0x1], 1 }
 0x5d8   :  { %1475 = vsyncpa [#allocation9], 1 }
 0x5d9   :  { %1476 = vsyncpa [#allocation7], 1 }
 0x5da   :  { %1478 = vsyncpa [#allocation7 + $0x1], 1 }

</bundles_post_ra>
